<compile_context>
chip_gen: v7x
topology: tpu7x:2x2x1
jax: 0.10.0
libtpu: 0.0.40
codegen_flags: <defaults>
</compile_context>

<pallas_src>
import jax
import jax.numpy as jnp
from jax.experimental import pallas as pl
from jax.experimental.pallas import tpu as pltpu

IN_DIM = 240
HID_DIM = 240
NUM_CLASSES = 34

HID_PAD = 256        # 240 -> 256 hidden width (lane-aligned)
OUT_PAD = 128        # 34  -> 128 (lane-dense output stores)
MAX_TB = 2048        # batch-tile upper bound (fits easily in 48 MiB scoped VMEM)
MIN_SPLIT_B = 512    # above this, use >= 2 grid steps so both v7x TCs get work


def _round_up(n, m):
    return ((n + m - 1) // m) * m


def _cdiv(n, m):
    return (n + m - 1) // m


def _pad_to(a, shape):
    return jnp.pad(a, [(0, t - s) for s, t in zip(a.shape, shape)])


def _pick_tile(B):
    if B < MIN_SPLIT_B:
        return _round_up(B, 16)                 # single tile, 16-row aligned
    if B < 2 * MAX_TB:
        return _round_up(_cdiv(B, 2), 16)       # exactly 2 tiles
    return MAX_TB                               # many large tiles


def mlp_kernel(x_ref, w1_ref, b1_ref, w2_ref, b2_ref, w3_ref, b3_ref, o_ref):
    # x tile arrives as raw f32 (TB, 240); cast to bf16 here so the pad/cast is
    # fused with the pipelined load instead of being a separate HBM pass.
    x = x_ref[...].astype(jnp.bfloat16)

    # layer1: Linear + ReLU (Dropout -> identity in eval mode)
    h1 = jnp.dot(x, w1_ref[...], preferred_element_type=jnp.float32)
    h1 = jnp.maximum(h1 + b1_ref[...], 0.0)

    # layer2: Linear + ReLU (Dropout -> identity in eval mode)
    h2 = jnp.dot(h1.astype(jnp.bfloat16), w2_ref[...],
                 preferred_element_type=jnp.float32)
    h2 = jnp.maximum(h2 + b2_ref[...], 0.0)

    # layer3: Linear
    out = jnp.dot(h2.astype(jnp.bfloat16), w3_ref[...],
                  preferred_element_type=jnp.float32)
    o_ref[...] = (out + b3_ref[...]).astype(o_ref.dtype)


def prepare_params(w1, b1, w2, b2, w3, b3):
    """One-time, call-invariant weight prep: lane-aligned zero-pad + bf16 cast."""
    w1_p = _pad_to(w1, (IN_DIM, HID_PAD)).astype(jnp.bfloat16)
    w2_p = _pad_to(w2, (HID_PAD, HID_PAD)).astype(jnp.bfloat16)
    w3_p = _pad_to(w3, (HID_PAD, OUT_PAD)).astype(jnp.bfloat16)
    b1_p = _pad_to(b1.reshape(1, -1), (1, HID_PAD)).astype(jnp.float32)
    b2_p = _pad_to(b2.reshape(1, -1), (1, HID_PAD)).astype(jnp.float32)
    b3_p = _pad_to(b3.reshape(1, -1), (1, OUT_PAD)).astype(jnp.float32)
    return w1_p, b1_p, w2_p, b2_p, w3_p, b3_p


@jax.jit
def nn_forward(x, w1_p, b1_p, w2_p, b2_p, w3_p, b3_p):
    B = x.shape[0]
    TB = _pick_tile(B)

    # Only the tiny-batch path (one tile larger than the array) needs a real
    # pad (<= 15 rows); otherwise the ragged last block is handled by Pallas
    # OOB masking (reads are garbage but per-row independent; writes masked).
    B_eff = B
    if TB > B:
        B_eff = TB
        x = jnp.pad(x, ((0, B_eff - B), (0, 0)))
    grid = (_cdiv(B_eff, TB),)

    resident = lambda shape: pl.BlockSpec(shape, lambda i: (0, 0))

    out = pl.pallas_call(
        mlp_kernel,
        out_shape=jax.ShapeDtypeStruct((B_eff, OUT_PAD), jnp.bfloat16),
        grid=grid,
        in_specs=[
            pl.BlockSpec((TB, IN_DIM), lambda i: (i, 0)),   # x: pipelined, raw f32
            resident(w1_p.shape), resident(b1_p.shape),      # weights stay put
            resident(w2_p.shape), resident(b2_p.shape),
            resident(w3_p.shape), resident(b3_p.shape),
        ],
        out_specs=pl.BlockSpec((TB, OUT_PAD), lambda i: (i, 0)),
        compiler_params=pltpu.CompilerParams(
            dimension_semantics=("parallel",),
            vmem_limit_bytes=48 * 1024 * 1024),
    )(x, w1_p, b1_p, w2_p, b2_p, w3_p, b3_p)

    # drop batch + class padding; equivalent of x.view(-1, numClasses)
    return out[:B, :NUM_CLASSES].astype(jnp.float32).reshape(-1, NUM_CLASSES)


def init_params(key):
    # Deterministic init mirroring nn.Linear's uniform(-1/sqrt(in), 1/sqrt(in)).
    ks = jax.random.split(key, 6)

    def lin(kw, kb, fan_in, fan_out):
        bound = 1.0 / jnp.sqrt(float(fan_in))
        w = jax.random.uniform(kw, (fan_in, fan_out), jnp.float32, -bound, bound)
        b = jax.random.uniform(kb, (fan_out,), jnp.float32, -bound, bound)
        return w, b

    w1, b1 = lin(ks[0], ks[1], IN_DIM, HID_DIM)
    w2, b2 = lin(ks[2], ks[3], HID_DIM, HID_DIM)
    w3, b3 = lin(ks[4], ks[5], HID_DIM, NUM_CLASSES)
    return w1, b1, w2, b2, w3, b3


if __name__ == "__main__":
    key = jax.random.PRNGKey(0)
    k_x, k_p = jax.random.split(key)

    params = init_params(k_p)
    packed = prepare_params(*params)          # one-time weight prep (hoisted)
    w1, b1, w2, b2, w3, b3 = params

    bf = lambda a: a.astype(jnp.bfloat16)

    def ref_forward(x):
        # Eval-mode reference with the same bf16 rounding of the matmul
        # operands as the kernel, f32 accumulation / bias / ReLU.
        h1 = jnp.maximum(
            jnp.dot(bf(x), bf(w1), preferred_element_type=jnp.float32) + b1, 0.0)
        h2 = jnp.maximum(
            jnp.dot(bf(h1), bf(w2), preferred_element_type=jnp.float32) + b2, 0.0)
        out = jnp.dot(bf(h2), bf(w3), preferred_element_type=jnp.float32) + b3
        return out.reshape(-1, NUM_CLASSES)

    # B=8  : tiny single-tile path (x padded to 16 rows inside the wrapper)
    # B=600: two-tile path with a ragged, OOB-masked last block
    for B in (8, 600):
        x = jax.random.normal(jax.random.fold_in(k_x, B), (B, IN_DIM), jnp.float32)
        out = nn_forward(x, *packed)
        jax.block_until_ready(out)
        assert out.shape == (B, NUM_CLASSES)
        ref = ref_forward(x)
        assert jnp.allclose(out, ref, atol=1e-2, rtol=1e-2), (
            float(jnp.max(jnp.abs(out - ref))))

    print("KERNEL_OK")
</pallas_src>

<mosaic_0001>
module attributes {stable_mosaic.version = 11 : i64} {
  func.func @mlp_kernel(%arg0: i32, %arg1: memref<16x240xf32, #tpu.memory_space<vmem>>, %arg2: memref<240x256xbf16, #tpu.memory_space<vmem>>, %arg3: memref<1x256xf32, #tpu.memory_space<vmem>>, %arg4: memref<256x256xbf16, #tpu.memory_space<vmem>>, %arg5: memref<1x256xf32, #tpu.memory_space<vmem>>, %arg6: memref<256x128xbf16, #tpu.memory_space<vmem>>, %arg7: memref<1x128xf32, #tpu.memory_space<vmem>>, %arg8: memref<16x128xbf16, #tpu.memory_space<vmem>>) attributes {dimension_semantics = [#tpu.dimension_semantics<parallel>], iteration_bounds = array<i64: 1>, scalar_prefetch = 0 : i64, scratch_operands = 0 : i64, tpu.core_type = #tpu.core_type<tc>, window_params = [{transform_indices = @transform_0, window_bounds = array<i64: 16, 240>}, {pipeline_mode = #tpu.pipeline_mode<synchronous>, transform_indices = @transform_1, window_bounds = array<i64: 240, 256>}, {pipeline_mode = #tpu.pipeline_mode<synchronous>, transform_indices = @transform_2, window_bounds = array<i64: 1, 256>}, {pipeline_mode = #tpu.pipeline_mode<synchronous>, transform_indices = @transform_3, window_bounds = array<i64: 256, 256>}, {pipeline_mode = #tpu.pipeline_mode<synchronous>, transform_indices = @transform_4, window_bounds = array<i64: 1, 256>}, {pipeline_mode = #tpu.pipeline_mode<synchronous>, transform_indices = @transform_5, window_bounds = array<i64: 256, 128>}, {pipeline_mode = #tpu.pipeline_mode<synchronous>, transform_indices = @transform_6, window_bounds = array<i64: 1, 128>}, {transform_indices = @transform_7, window_bounds = array<i64: 16, 128>}]} {
    %c0 = arith.constant 0 : index
    %c0_0 = arith.constant 0 : index
    %0 = vector.load %arg1[%c0, %c0_0] : memref<16x240xf32, #tpu.memory_space<vmem>>, vector<16x240xf32>
    %1 = arith.truncf %0 : vector<16x240xf32> to vector<16x240xbf16>
    %c0_1 = arith.constant 0 : index
    %c0_2 = arith.constant 0 : index
    %2 = vector.load %arg2[%c0_1, %c0_2] : memref<240x256xbf16, #tpu.memory_space<vmem>>, vector<240x256xbf16>
    %cst = arith.constant dense<0.000000e+00> : vector<16x256xf32>
    %3 = tpu.matmul %1, %2, %cst {dimension_numbers = #tpu.dot_dimension_numbers<[1], [0], [0], [1], [0, 0, 1, 1], [], []>} : vector<16x240xbf16>, vector<240x256xbf16>, vector<16x256xf32> -> vector<16x256xf32>
    %c0_3 = arith.constant 0 : index
    %c0_4 = arith.constant 0 : index
    %4 = vector.load %arg3[%c0_3, %c0_4] : memref<1x256xf32, #tpu.memory_space<vmem>>, vector<1x256xf32>
    %5 = vector.broadcast %4 : vector<1x256xf32> to vector<16x256xf32>
    %6 = arith.addf %3, %5 : vector<16x256xf32>
    %cst_5 = arith.constant 0.000000e+00 : f32
    %7 = vector.broadcast %cst_5 : f32 to vector<16x256xf32>
    %8 = arith.maximumf %6, %7 : vector<16x256xf32>
    %9 = arith.truncf %8 : vector<16x256xf32> to vector<16x256xbf16>
    %c0_6 = arith.constant 0 : index
    %c0_7 = arith.constant 0 : index
    %10 = vector.load %arg4[%c0_6, %c0_7] : memref<256x256xbf16, #tpu.memory_space<vmem>>, vector<256x256xbf16>
    %cst_8 = arith.constant dense<0.000000e+00> : vector<16x256xf32>
    %11 = tpu.matmul %9, %10, %cst_8 {dimension_numbers = #tpu.dot_dimension_numbers<[1], [0], [0], [1], [0, 0, 1, 1], [], []>} : vector<16x256xbf16>, vector<256x256xbf16>, vector<16x256xf32> -> vector<16x256xf32>
    %c0_9 = arith.constant 0 : index
    %c0_10 = arith.constant 0 : index
    %12 = vector.load %arg5[%c0_9, %c0_10] : memref<1x256xf32, #tpu.memory_space<vmem>>, vector<1x256xf32>
    %13 = vector.broadcast %12 : vector<1x256xf32> to vector<16x256xf32>
    %14 = arith.addf %11, %13 : vector<16x256xf32>
    %cst_11 = arith.constant 0.000000e+00 : f32
    %15 = vector.broadcast %cst_11 : f32 to vector<16x256xf32>
    %16 = arith.maximumf %14, %15 : vector<16x256xf32>
    %17 = arith.truncf %16 : vector<16x256xf32> to vector<16x256xbf16>
    %c0_12 = arith.constant 0 : index
    %c0_13 = arith.constant 0 : index
    %18 = vector.load %arg6[%c0_12, %c0_13] : memref<256x128xbf16, #tpu.memory_space<vmem>>, vector<256x128xbf16>
    %cst_14 = arith.constant dense<0.000000e+00> : vector<16x128xf32>
    %19 = tpu.matmul %17, %18, %cst_14 {dimension_numbers = #tpu.dot_dimension_numbers<[1], [0], [0], [1], [0, 0, 1, 1], [], []>} : vector<16x256xbf16>, vector<256x128xbf16>, vector<16x128xf32> -> vector<16x128xf32>
    %c0_15 = arith.constant 0 : index
    %c0_16 = arith.constant 0 : index
    %20 = vector.load %arg7[%c0_15, %c0_16] : memref<1x128xf32, #tpu.memory_space<vmem>>, vector<1x128xf32>
    %21 = vector.broadcast %20 : vector<1x128xf32> to vector<16x128xf32>
    %22 = arith.addf %19, %21 : vector<16x128xf32>
    %23 = arith.truncf %22 : vector<16x128xf32> to vector<16x128xbf16>
    %c0_17 = arith.constant 0 : index
    %c0_18 = arith.constant 0 : index
    %24 = vector.load %arg8[%c0_17, %c0_18] : memref<16x128xbf16, #tpu.memory_space<vmem>>, vector<16x128xbf16>
    tpu.vector_store %arg8[%c0_17, %c0_18], %23 {strides = array<i32>} : memref<16x128xbf16, #tpu.memory_space<vmem>>, vector<16x128xbf16>,
    return
  }
  func.func @transform_0(%arg0: i32) -> (i32, i32) {
    %c0_i32 = arith.constant 0 : i32
    %c0_i32_0 = arith.constant 0 : i32
    return %arg0, %c0_i32 : i32, i32
  }
  func.func @transform_1(%arg0: i32) -> (i32, i32) {
    %c0_i32 = arith.constant 0 : i32
    %c0_i32_0 = arith.constant 0 : i32
    %c0_i32_1 = arith.constant 0 : i32
    return %c0_i32, %c0_i32_0 : i32, i32
  }
  func.func @transform_2(%arg0: i32) -> (i32, i32) {
    %c0_i32 = arith.constant 0 : i32
    %c0_i32_0 = arith.constant 0 : i32
    %c0_i32_1 = arith.constant 0 : i32
    return %c0_i32, %c0_i32_0 : i32, i32
  }
  func.func @transform_3(%arg0: i32) -> (i32, i32) {
    %c0_i32 = arith.constant 0 : i32
    %c0_i32_0 = arith.constant 0 : i32
    %c0_i32_1 = arith.constant 0 : i32
    return %c0_i32, %c0_i32_0 : i32, i32
  }
  func.func @transform_4(%arg0: i32) -> (i32, i32) {
    %c0_i32 = arith.constant 0 : i32
    %c0_i32_0 = arith.constant 0 : i32
    %c0_i32_1 = arith.constant 0 : i32
    return %c0_i32, %c0_i32_0 : i32, i32
  }
  func.func @transform_5(%arg0: i32) -> (i32, i32) {
    %c0_i32 = arith.constant 0 : i32
    %c0_i32_0 = arith.constant 0 : i32
    %c0_i32_1 = arith.constant 0 : i32
    return %c0_i32, %c0_i32_0 : i32, i32
  }
  func.func @transform_6(%arg0: i32) -> (i32, i32) {
    %c0_i32 = arith.constant 0 : i32
    %c0_i32_0 = arith.constant 0 : i32
    %c0_i32_1 = arith.constant 0 : i32
    return %c0_i32, %c0_i32_0 : i32, i32
  }
  func.func @transform_7(%arg0: i32) -> (i32, i32) {
    %c0_i32 = arith.constant 0 : i32
    %c0_i32_0 = arith.constant 0 : i32
    return %arg0, %c0_i32 : i32, i32
  }
}

</mosaic_0001>

<bundles_post_ra>
// kernel: nn_forward.1
= control target key start
LH: loop header
LB: loop body
LE: loop exit
PB: predicated region body
PF: predicated region fallthrough
CT: control target
= control target key end

     0   :  { %12 = vsyncpa [#allocation3], 0  ;;  %s1175_s0 = inlined_call_operand.vmem [shape: f32[16,240], index: 0, kind: input, shape index: {}]   ;;  %s1176_s1 = inlined_call_operand.hbm [shape: bf16[240,256], index: 1, kind: input, shape index: {}]   ;;  %s1177_s2 = inlined_call_operand.vmem [shape: f32[1,256], index: 2, kind: input, shape index: {}]   ;;  %s1178_s3 = inlined_call_operand.hbm [shape: bf16[256,256], index: 3, kind: input, shape index: {}]   ;;  %s1179_s4 = inlined_call_operand.vmem [shape: f32[1,256], index: 4, kind: input, shape index: {}]   ;;  %s1180_s5 = inlined_call_operand.hbm [shape: bf16[256,128], index: 5, kind: input, shape index: {}]   ;;  %s1181_s6 = inlined_call_operand.vmem [shape: f32[1,128], index: 6, kind: input, shape index: {}]   ;;  %s1182_s7 = inlined_call_operand.vmem [shape: bf16[16,128], index: 7, kind: output, shape index: {}]  }
   0x1   :  { %13 = vsyncpa [#allocation5], 0  ;;  %s1061_s24 = smov [#allocation4]   ;;  %s1062_s26 = smov [#allocation2]  }
   0x2   :  { %s35_s25 = sshll.u32 %s1061_s24, 4  ;;  %s21_s27 = sshll.u32 %s1062_s26, 4  ;;  %s36_s25 = int_to_ptr.vmem [resolvable:$true] %s35_s25  ;;  %s1108_s27 = int_to_ptr.vmem [resolvable:$true] %s21_s27 }
   0x3   :  { %s991_s30 = scalar_lea.hbm %s1178_s3, 4096 }
   0x4   :  { %p992_p0 = scmp.ne.s32.totalorder %s1178_s3, %s991_s30  ;;  %p995_p1 = scmp.lt.u32.totalorder %s991_s30, %s1178_s3 }
   0x6   :  { %p997_p2 = pnand %p995_p1, %p992_p0 }
   0x8   :  { %1000 = shalt.err (!%p997_p2)
}
   0x9   :  { %s1001_s12 = scalar_lea.vmem %s36_s25, 4096  ;;  %p1006_p4 = scmp.lt.s32.totalorder %s36_s25, %s36_s25 }
   0xa   :  { %p1002_p3 = scmp.ne.s32.totalorder %s36_s25, %s1001_s12  ;;  %p1007_p5 = scmp.lt.s32.totalorder %s1001_s12, %s1001_s12 }
   0xc   :  { %p1008_p6 = por %p1007_p5, %p1006_p4 }
   0xe   :  { %p1009_p7 = pnand %p1008_p6, %p1002_p3 }
  0x10   :  { %1012 = shalt.err (!%p1009_p7)
}
  0x11   :  { %s1063_s13 = smov 128   ;;  %s1064_s14 = smov 8  }
  0x12   :  { %41 = dma.hbm_to_vmem [thread:$0]  %s1178_s3, 4096, %s36_s25, [#allocation5], %s1063_s13, %s1063_s13, %s1064_s14  }
  0x13   :  { %s1013_s19 = scalar_lea.hbm %s1176_s1, 3840 }
  0x14   :  { %p1014_p8 = scmp.ne.s32.totalorder %s1176_s1, %s1013_s19  ;;  %p1017_p9 = scmp.lt.u32.totalorder %s1013_s19, %s1176_s1 }
  0x16   :  { %p1019_p10 = pnand %p1017_p9, %p1014_p8 }
  0x18   :  { %1022 = shalt.err (!%p1019_p10)
}
  0x19   :  { %s1023_s24 = scalar_lea.vmem %s1108_s27, 3840  ;;  %p1028_p12 = scmp.lt.s32.totalorder %s1108_s27, %s1108_s27 }
  0x1a   :  { %p1024_p11 = scmp.ne.s32.totalorder %s1108_s27, %s1023_s24  ;;  %p1029_p13 = scmp.lt.s32.totalorder %s1023_s24, %s1023_s24 }
  0x1c   :  { %p1030_p0 = por %p1029_p13, %p1028_p12 }
  0x1e   :  { %p1031_p1 = pnand %p1030_p0, %p1024_p11 }
  0x20   :  { %1034 = shalt.err (!%p1031_p1)
}
  0x21   :  { %27 = dma.hbm_to_vmem [thread:$0]  %s1176_s1, 3840, %s1108_s27, [#allocation3], %s1063_s13, %s1063_s13, %s1064_s14  }
  0x22   :  { %s1065_s26 = smov [#allocation6]   ;;  %s1035_s8 = scalar_lea.hbm %s1180_s5, 2048 }
  0x23   :  { %s49_s28 = sshll.u32 %s1065_s26, 4  ;;  %p1036_p2 = scmp.ne.s32.totalorder %s1180_s5, %s1035_s8  ;;  %s50_s28 = int_to_ptr.vmem [resolvable:$true] %s49_s28 }
  0x24   :  { %p1039_p3 = scmp.lt.u32.totalorder %s1035_s8, %s1180_s5 }
  0x26   :  { %p1041_p4 = pnand %p1039_p3, %p1036_p2 }
  0x28   :  { %1044 = shalt.err (!%p1041_p4)
}
  0x29   :  { %s1045_s15 = scalar_lea.vmem %s50_s28, 2048  ;;  %p1050_p6 = scmp.lt.s32.totalorder %s50_s28, %s50_s28 }
  0x2a   :  { %p1046_p5 = scmp.ne.s32.totalorder %s50_s28, %s1045_s15  ;;  %p1051_p7 = scmp.lt.s32.totalorder %s1045_s15, %s1045_s15 }
  0x2c   :  { %p1052_p8 = por %p1051_p7, %p1050_p6 }
  0x2e   :  { %p1053_p9 = pnand %p1052_p8, %p1046_p5 }
  0x30   :  { %1056 = shalt.err (!%p1053_p9)
}
  0x31   :  { %s1066_s1 = smov 64   ;;  %s1067_s27 = smov 4  }
  0x32   :  { %55 = dma.hbm_to_vmem [thread:$0]  %s1180_s5, 2048, %s50_s28, [#allocation5], %s1066_s1, %s1066_s1, %s1067_s27  }
  0x33   :  { %1057 = dma.done.wait [#allocation3], 3840  }
  0x34   :  { %1058 = vsyncadd [#allocation3], 4294963456 }
  0x35   :  { %1059 = dma.done.wait [#allocation5], 6144  }
  0x36   :  { %1060 = vsyncadd [#allocation5], 4294961152  ;;  %v882_v0 = vld [vmem:[#allocation2 + $0x4] ss:$8 sps:$4 sm:$0xff]   ;;  %v884_v1 = vld [vmem:[#allocation2] ss:$8 sps:$4 sm:$0xff]  }
  0x37   :  { %270 = vmatprep.subr.bf16.mxu0 %v882_v0  ;;  %v885_v2 = vld [vmem:[#allocation2 + $0x14] ss:$8 sps:$4 sm:$0xff]   ;;  %v887_v3 = vld [vmem:[#allocation2 + $0x10] ss:$8 sps:$4 sm:$0xff]   ;;  %v888_v4 = vld [vmem:[#allocation2 + $0x24] ss:$8 sps:$4 sm:$0xff]  }
  0x38   :  { %271 = vmatpush1.bf16.msra.mxu0 %v884_v1  ;;  %v890_v5 = vld [vmem:[#allocation2 + $0x20] ss:$8 sps:$4 sm:$0xff]   ;;  %v891_v6 = vld [vmem:[#allocation2 + $0x34] ss:$8 sps:$4 sm:$0xff]   ;;  %v893_v7 = vld [vmem:[#allocation2 + $0x30] ss:$8 sps:$4 sm:$0xff]  }
  0x39   :  { %272 = vmatprep.subr.bf16.mxu0 %v885_v2  ;;  %v894_v8 = vld [vmem:[#allocation2 + $0x44] ss:$8 sps:$4 sm:$0xff]   ;;  %v896_v9 = vld [vmem:[#allocation2 + $0x40] ss:$8 sps:$4 sm:$0xff]   ;;  %v897_v10 = vld [vmem:[#allocation2 + $0x54] ss:$8 sps:$4 sm:$0xff]  }
  0x3a   :  { %v899_v11 = vld [vmem:[#allocation2 + $0x50] ss:$8 sps:$4 sm:$0xff]   ;;  %v900_v12 = vld [vmem:[#allocation2 + $0x64] ss:$8 sps:$4 sm:$0xff]   ;;  %vm266_vm0 = vcmask 916480  }
  0x3b   :  { %v69_v13 = vld [vmem:[%s1175_s0 + $0x8] sm:$0xff]  ;;  %v71_v14 = vld [vmem:[%s1175_s0 + $0x18] sm:$0xff]  ;;  %v68_v52 = vld [vmem:[%s1175_s0] sm:$0xff] }
  0x3c   :  { %273 = vmatpush1.bf16.msra.mxu0 %v887_v3  ;;  %v73_v15 = vpack.c.bf16 %v71_v14, %v69_v13  ;;  %v927_v16 = vld [vmem:[#allocation4 + $0x4] ss:$8 sps:$4 sm:$0xff]   ;;  %v929_v17 = vld [vmem:[#allocation4] ss:$8 sps:$4 sm:$0xff]   ;;  %v902_v18 = vld [vmem:[#allocation2 + $0x60] ss:$8 sps:$4 sm:$0xff]  }
  0x3d   :  { %274 = vmatprep.subr.bf16.mxu0 %v888_v4  ;;  %v930_v19 = vld [vmem:[#allocation4 + $0x14] ss:$8 sps:$4 sm:$0xff]   ;;  %v903_v20 = vld [vmem:[#allocation2 + $0x74] ss:$8 sps:$4 sm:$0xff]   ;;  %523 = vmatprep.subr.bf16.mxu1 %v927_v16  ;;  %v932_v21 = vld [vmem:[#allocation4 + $0x10] ss:$8 sps:$4 sm:$0xff]  }
  0x3e   :  { %794 = vmatprep.mubr.msk.bf16.mxu0 %vm266_vm0, %v73_v15  ;;  %524 = vmatpush1.bf16.msra.mxu1 %v929_v17  ;;  %v933_v22 = vld [vmem:[#allocation4 + $0x24] ss:$8 sps:$4 sm:$0xff]   ;;  %v905_v23 = vld [vmem:[#allocation2 + $0x70] ss:$8 sps:$4 sm:$0xff]   ;;  %v906_v24 = vld [vmem:[#allocation2 + $0x84] ss:$8 sps:$4 sm:$0xff]   ;;  %v106_v15 = vlaneseq }
  0x3f   :  { %525 = vmatprep.subr.bf16.mxu1 %v930_v19  ;;  %v935_v25 = vld [vmem:[#allocation4 + $0x20] ss:$8 sps:$4 sm:$0xff]   ;;  %v936_v26 = vld [vmem:[#allocation4 + $0x34] ss:$8 sps:$4 sm:$0xff]   ;;  %v908_v27 = vld [vmem:[#allocation2 + $0x80] ss:$8 sps:$4 sm:$0xff]  }
  0x40   :  { %275 = vmatpush1.bf16.msra.mxu0 %v890_v5  ;;  %v909_v28 = vld [vmem:[#allocation2 + $0x94] ss:$8 sps:$4 sm:$0xff]   ;;  %v938_v29 = vld [vmem:[#allocation4 + $0x30] ss:$8 sps:$4 sm:$0xff]   ;;  %v911_v31 = vld [vmem:[#allocation2 + $0x90] ss:$8 sps:$4 sm:$0xff]  }
  0x41   :  { %276 = vmatprep.subr.bf16.mxu0 %v891_v6  ;;  %v939_v30 = vld [vmem:[#allocation4 + $0x44] ss:$8 sps:$4 sm:$0xff]   ;;  %v912_v32 = vld [vmem:[#allocation2 + $0xa4] ss:$8 sps:$4 sm:$0xff]   ;;  %v941_v33 = vld [vmem:[#allocation4 + $0x40] ss:$8 sps:$4 sm:$0xff]  }
  0x42   :  { %526 = vmatpush1.bf16.msra.mxu1 %v932_v21  ;;  %v914_v34 = vld [vmem:[#allocation2 + $0xa0] ss:$8 sps:$4 sm:$0xff]   ;;  %v942_v35 = vld [vmem:[#allocation4 + $0x54] ss:$8 sps:$4 sm:$0xff]   ;;  %v915_v36 = vld [vmem:[#allocation2 + $0xb4] ss:$8 sps:$4 sm:$0xff]  }
  0x43   :  { %527 = vmatprep.subr.bf16.mxu1 %v933_v22  ;;  %v944_v37 = vld [vmem:[#allocation4 + $0x50] ss:$8 sps:$4 sm:$0xff]   ;;  %v945_v38 = vld [vmem:[#allocation4 + $0x64] ss:$8 sps:$4 sm:$0xff]   ;;  %v917_v39 = vld [vmem:[#allocation2 + $0xb0] ss:$8 sps:$4 sm:$0xff]  }
  0x44   :  { %277 = vmatpush1.bf16.msra.mxu0 %v893_v7  ;;  %v918_v40 = vld [vmem:[#allocation2 + $0xc4] ss:$8 sps:$4 sm:$0xff]   ;;  %v947_v41 = vld [vmem:[#allocation4 + $0x60] ss:$8 sps:$4 sm:$0xff]   ;;  %v920_v43 = vld [vmem:[#allocation2 + $0xc0] ss:$8 sps:$4 sm:$0xff]  }
  0x45   :  { %278 = vmatprep.subr.bf16.mxu0 %v894_v8  ;;  %v948_v42 = vld [vmem:[#allocation4 + $0x74] ss:$8 sps:$4 sm:$0xff]   ;;  %v921_v44 = vld [vmem:[#allocation2 + $0xd4] ss:$8 sps:$4 sm:$0xff]   ;;  %v950_v45 = vld [vmem:[#allocation4 + $0x70] ss:$8 sps:$4 sm:$0xff]  }
  0x46   :  { %528 = vmatpush1.bf16.msra.mxu1 %v935_v25  ;;  %v951_v46 = vld [vmem:[#allocation4 + $0x84] ss:$8 sps:$4 sm:$0xff]   ;;  %v923_v47 = vld [vmem:[#allocation2 + $0xd0] ss:$8 sps:$4 sm:$0xff]   ;;  %v924_v48 = vld [vmem:[#allocation2 + $0xe4] ss:$8 sps:$4 sm:$0xff]  }
  0x47   :  { %529 = vmatprep.subr.bf16.mxu1 %v936_v26  ;;  %v953_v49 = vld [vmem:[#allocation4 + $0x80] ss:$8 sps:$4 sm:$0xff]   ;;  %v954_v50 = vld [vmem:[#allocation4 + $0x94] ss:$8 sps:$4 sm:$0xff]   ;;  %v926_v51 = vld [vmem:[#allocation2 + $0xe0] ss:$8 sps:$4 sm:$0xff]  }
  0x48   :  { %279 = vmatpush1.bf16.msra.mxu0 %v896_v9  ;;  %v70_v53 = vld [vmem:[%s1175_s0 + $0x10] sm:$0xff]  ;;  %v956_v54 = vld [vmem:[#allocation4 + $0x90] ss:$8 sps:$4 sm:$0xff]   ;;  %v960_v58 = vld [vmem:[#allocation4 + $0xb4] ss:$8 sps:$4 sm:$0xff]   ;;  %v107_v16 = vshrl.u32 %v106_v15, 7 }
  0x49   :  { %280 = vmatprep.subr.bf16.mxu0 %v897_v10  ;;  %v72_v55 = vpack.c.bf16 %v70_v53, %v68_v52  ;;  %v957_v56 = vld [vmem:[#allocation4 + $0xa4] ss:$8 sps:$4 sm:$0xff]   ;;  %v959_v57 = vld [vmem:[#allocation4 + $0xa0] ss:$8 sps:$4 sm:$0xff]   ;;  %v962_v59 = vld [vmem:[#allocation4 + $0xb0] ss:$8 sps:$4 sm:$0xff]  }
  0x4a   :  { %530 = vmatpush1.bf16.msra.mxu1 %v938_v29  ;;  %v963_v60 = vld [vmem:[#allocation4 + $0xc4] ss:$8 sps:$4 sm:$0xff]   ;;  %v965_v61 = vld [vmem:[#allocation4 + $0xc0] ss:$8 sps:$4 sm:$0xff]   ;;  %v966_v62 = vld [vmem:[#allocation4 + $0xd4] ss:$8 sps:$4 sm:$0xff]  }
  0x4b   :  { %531 = vmatprep.subr.bf16.mxu1 %v939_v30  ;;  %v968_v63 = vld [vmem:[#allocation4 + $0xd0] ss:$8 sps:$4 sm:$0xff]   ;;  %v969_v0 = vld [vmem:[#allocation4 + $0xe4] ss:$8 sps:$4 sm:$0xff]   ;;  %v971_v1 = vld [vmem:[#allocation4 + $0xe0] ss:$8 sps:$4 sm:$0xff]  }
  0x4c   :  { %281 = vmatpush1.bf16.msra.mxu0 %v899_v11  ;;  %v972_v2 = vld [vmem:[#allocation4 + $0xf4] ss:$8 sps:$4 sm:$0xff]   ;;  %v974_v3 = vld [vmem:[#allocation4 + $0xf0] ss:$8 sps:$4 sm:$0xff]   ;;  %v975_v4 = vld [vmem:[#allocation6 + $0x40] sm:$0xff]   ;;  %v108_v17 = vsub.s32 0, %v107_v16 }
  0x4d   :  { %282 = vmatprep.subr.bf16.mxu0 %v900_v12  ;;  %v976_v5 = vld [vmem:[#allocation6] sm:$0xff]   ;;  %v977_v6 = vld [vmem:[#allocation6 + $0x48] sm:$0xff]   ;;  %v979_v8 = vld [vmem:[#allocation6 + $0x50] sm:$0xff]   ;;  %v112_v19 = vsub.s32 1, %v107_v16 }
  0x4e   :  { %532 = vmatpush1.bf16.msra.mxu1 %v941_v33  ;;  %v978_v7 = vld [vmem:[#allocation6 + $0x8] sm:$0xff]   ;;  %v980_v9 = vld [vmem:[#allocation6 + $0x10] sm:$0xff]   ;;  %v981_v10 = vld [vmem:[#allocation6 + $0x58] sm:$0xff]  }
  0x4f   :  { %533 = vmatprep.subr.bf16.mxu1 %v942_v35  ;;  %v982_v11 = vld [vmem:[#allocation6 + $0x18] sm:$0xff]   ;;  %v983_v12 = vld [vmem:[#allocation6 + $0x60] sm:$0xff]   ;;  %v985_v14 = vld [vmem:[#allocation6 + $0x68] sm:$0xff]  }
  0x50   :  { %283 = vmatpush1.bf16.msra.mxu0 %v902_v18  ;;  %v984_v13 = vld [vmem:[#allocation6 + $0x20] sm:$0xff]   ;;  %v104_v18 = vld [vmem:[%s1177_s2] sm:$0x3] }
  0x51   :  { %284 = vmatprep.subr.bf16.mxu0 %v903_v20  ;;  %v109_v20 = vrot.slane %v104_v18, %v108_v17  ;;  %v113_v21 = vrot.slane %v104_v18, %v112_v19 }
  0x52   :  { %534 = vmatpush1.bf16.msra.mxu1 %v944_v37  ;;  %v987_v37 = vld [vmem:[#allocation6 + $0x70] sm:$0xff]  }
  0x53   :  { %535 = vmatprep.subr.bf16.mxu1 %v945_v38  ;;  %v988_v38 = vld [vmem:[#allocation6 + $0x30] sm:$0xff]  }
  0x54   :  { %285 = vmatpush1.bf16.msra.mxu0 %v905_v23 }
  0x55   :  { %286 = vmatprep.subr.bf16.mxu0 %v906_v24 }
  0x56   :  { %536 = vmatpush1.bf16.msra.mxu1 %v947_v41  ;;  %v351_v41 = vld [vmem:[%s1179_s4] sm:$0x3] }
  0x57   :  { %537 = vmatprep.subr.bf16.mxu1 %v948_v42  ;;  %v356_v42 = vrot.slane %v351_v41, %v108_v17 }
  0x58   :  { %287 = vmatpush1.bf16.msra.mxu0 %v908_v27 }
  0x59   :  { %288 = vmatprep.subr.bf16.mxu0 %v909_v28 }
  0x5a   :  { %538 = vmatpush1.bf16.msra.mxu1 %v950_v45 }
  0x5b   :  { %539 = vmatprep.subr.bf16.mxu1 %v951_v46 }
  0x5c   :  { %289 = vmatpush1.bf16.msra.mxu0 %v911_v31 }
  0x5d   :  { %290 = vmatprep.subr.bf16.mxu0 %v912_v32 }
  0x5e   :  { %540 = vmatpush1.bf16.msra.mxu1 %v953_v49 }
  0x5f   :  { %541 = vmatprep.subr.bf16.mxu1 %v954_v50 }
  0x60   :  { %291 = vmatpush1.bf16.msra.mxu0 %v914_v34 }
  0x61   :  { %292 = vmatprep.subr.bf16.mxu0 %v915_v36  ;;  %v986_v36 = vld [vmem:[#allocation6 + $0x28] sm:$0xff]  }
  0x62   :  { %542 = vmatpush1.bf16.msra.mxu1 %v956_v54 }
  0x63   :  { %543 = vmatprep.subr.bf16.mxu1 %v957_v56 }
  0x64   :  { %293 = vmatpush1.bf16.msra.mxu0 %v917_v39  ;;  %v989_v39 = vld [vmem:[#allocation6 + $0x78] sm:$0xff]  }
  0x65   :  { %294 = vmatprep.subr.bf16.mxu0 %v918_v40  ;;  %v990_v40 = vld [vmem:[#allocation6 + $0x38] sm:$0xff]  }
  0x66   :  { %544 = vmatpush1.bf16.msra.mxu1 %v959_v57 }
  0x67   :  { %545 = vmatprep.subr.bf16.mxu1 %v960_v58 }
  0x68   :  { %295 = vmatpush1.bf16.msra.mxu0 %v920_v43  ;;  %v360_v43 = vrot.slane %v351_v41, %v112_v19 }
  0x69   :  { %296 = vmatprep.subr.bf16.mxu0 %v921_v44 }
  0x6a   :  { %546 = vmatpush1.bf16.msra.mxu1 %v962_v59 }
  0x6b   :  { %547 = vmatprep.subr.bf16.mxu1 %v963_v60 }
  0x6c   :  { %297 = vmatpush1.bf16.msra.mxu0 %v923_v47 }
  0x6d   :  { %298 = vmatprep.subr.bf16.mxu0 %v924_v48 }
  0x6e   :  { %548 = vmatpush1.bf16.msra.mxu1 %v965_v61 }
  0x6f   :  { %549 = vmatprep.subr.bf16.mxu1 %v966_v62  ;;  %v827_v62 = vld [vmem:[%s1181_s6] ss:$0 sm:$0xff] }
  0x70   :  { %299 = vmatpush1.bf16.msra.mxu0 %v926_v51 }
  0x71   :  { %853 = vmatprep.subr.bf16.mxu0 %v975_v4 }
  0x72   :  { %550 = vmatpush1.bf16.msra.mxu1 %v968_v63 }
  0x73   :  { %303 = vmatmul.mubr.bf16.vlgmr.msra.gmra.mrb[0].mxu0 %v72_v55  ;;  %551 = vmatprep.subr.bf16.mxu1 %v969_v0 }
  0x74   :  { %854 = vmatpush3.bf16.msra.mxu0 %v976_v5 }
  0x75   :  { %855 = vmatprep.subr.bf16.mxu0 %v977_v6 }
  0x76   :  { %552 = vmatpush1.bf16.msra.mxu1 %v971_v1 }
  0x77   :  { %553 = vmatprep.subr.bf16.mxu1 %v972_v2 }
  0x78   :  { %856 = vmatpush3.bf16.msra.mxu0 %v978_v7 }
  0x79   :  { %857 = vmatprep.subr.bf16.mxu0 %v979_v8 }
  0x7a   :  { %554 = vmatpush1.bf16.msra.mxu1 %v974_v3 }
  0x7c   :  { %858 = vmatpush3.bf16.msra.mxu0 %v980_v9 }
  0x7d   :  { %859 = vmatprep.subr.bf16.mxu0 %v981_v10 }
  0x80   :  { %860 = vmatpush3.bf16.msra.mxu0 %v982_v11 }
  0x81   :  { %861 = vmatprep.subr.bf16.mxu0 %v983_v12 }
  0x84   :  { %862 = vmatpush3.bf16.msra.mxu0 %v984_v13 }
  0x85   :  { %863 = vmatprep.subr.bf16.mxu0 %v985_v14 }
  0x88   :  { %864 = vmatpush3.bf16.msra.mxu0 %v986_v36 }
  0x89   :  { %865 = vmatprep.subr.bf16.mxu0 %v987_v37 }
  0x8c   :  { %866 = vmatpush3.bf16.msra.mxu0 %v988_v38 }
  0x8d   :  { %867 = vmatprep.subr.bf16.mxu0 %v989_v39 }
  0x90   :  { %868 = vmatpush3.bf16.msra.mxu0 %v990_v40 }
 0x146   :  { %v304_v22 = vpop.f32.mrb[0].mxu0 }
 0x147   :  { %v305_v23 = vadd.f32 %v304_v22, %v109_v20  ;;  %v306_v24 = vpop.f32.mrb[1].mxu0 }
 0x148   :  { %v307_v25 = vadd.f32 %v306_v24, %v113_v21  ;;  %v308_v26 = vpop.f32.mrb[2].mxu0 }
 0x149   :  { %v309_v27 = vadd.f32 %v308_v26, %v109_v20  ;;  %v310_v28 = vpop.f32.mrb[3].mxu0  ;;  %v313_v30 = vmax.f32 %v305_v23, 0.0 }
 0x14a   :  { %v311_v29 = vadd.f32 %v310_v28, %v113_v21  ;;  %v314_v32 = vmax.f32 %v307_v25, 0.0 }
 0x14b   :  { %v315_v31 = vmax.f32 %v309_v27, 0.0 }
 0x14c   :  { %v316_v33 = vmax.f32 %v311_v29, 0.0 }
 0x14d   :  { %v317_v34 = vpack.c.bf16 %v315_v31, %v313_v30 }
 0x14e   :  { %v318_v35 = vpack.c.bf16 %v316_v33, %v314_v32 }
 0x150   :  { %555 = vmatprep.mubr.bf16.mxu1 %v318_v35 }
 0x151   :  { %556 = vmatmul.mubr.bf16.vlgmr.msra.gmra.mrb[0].mxu1 %v317_v34 }
 0x224   :  { %v557_v44 = vpop.f32.mrb[0].mxu1 }
 0x225   :  { %v558_v45 = vadd.f32 %v557_v44, %v356_v42  ;;  %v559_v46 = vpop.f32.mrb[1].mxu1 }
 0x226   :  { %v560_v47 = vadd.f32 %v559_v46, %v360_v43  ;;  %v561_v48 = vpop.f32.mrb[2].mxu1 }
 0x227   :  { %v562_v49 = vadd.f32 %v561_v48, %v356_v42  ;;  %v563_v50 = vpop.f32.mrb[3].mxu1  ;;  %v566_v52 = vmax.f32 %v558_v45, 0.0 }
 0x228   :  { %v564_v51 = vadd.f32 %v563_v50, %v360_v43  ;;  %v567_v54 = vmax.f32 %v560_v47, 0.0 }
 0x229   :  { %v568_v53 = vmax.f32 %v562_v49, 0.0 }
 0x22a   :  { %v569_v55 = vmax.f32 %v564_v51, 0.0 }
 0x22b   :  { %v570_v56 = vpack.c.bf16 %v568_v53, %v566_v52 }
 0x22c   :  { %v571_v57 = vpack.c.bf16 %v569_v55, %v567_v54 }
 0x22e   :  { %739 = vmatprep.mubr.bf16.mxu0 %v571_v57 }
 0x22f   :  { %740 = vmatmul.mubr.bf16.vlgmr.msra.gmra.mrb[4].mxu0 %v570_v56 }
 0x302   :  { %v869_v58 = vpop.f32.mrb[4].mxu0 }
 0x303   :  { %v870_v59 = vpop.f32.mrb[5].mxu0 }
 0x304   :  { %v871_v60 = vadd.f32 %v870_v59, %v869_v58  ;;  %v872_v61 = vpop.f32.mrb[6].mxu0 }
 0x305   :  { %v873_v63 = vpop.f32.mrb[7].mxu0 }
 0x306   :  { %v874_v0 = vadd.f32 %v873_v63, %v872_v61  ;;  %v742_v1 = vadd.f32 %v871_v60, %v827_v62 }
 0x308   :  { %v745_v2 = vadd.f32 %v874_v0, %v827_v62 }
 0x30a   :  { %v851_v3 = vpack.c.bf16 %v745_v2, %v742_v1 }
 0x30c   :  { %852 = vst [vmem:[%s1182_s7] sm:$0xff] %v851_v3  }
 0x30d   :  { %762 = vsyncpa [#allocation3], 1 }
 0x30e   :  { %763 = vsyncpa [#allocation5], 1 }

</bundles_post_ra>
